<compile_context>
chip_gen: v5e
topology: v5e:2x2
jax: 0.10.0
libtpu: 0.0.40
codegen_flags: <defaults>
</compile_context>

<pallas_src>
import functools

import jax
import jax.numpy as jnp
from jax.experimental import pallas as pl
from jax.experimental.pallas import tpu as pltpu


def _round_up(a, b):
    return -(-a // b) * b


def _align_down(a, b):
    return max(b, (a // b) * b)


def _phys_bytes(rows, cols, itemsize):
    """Approximate physical VMEM footprint of a (rows, cols) tile ((8*pack,128) tiling)."""
    sub = max(8, 32 // itemsize)
    return _round_up(max(rows, 1), sub) * _round_up(max(cols, 1), 128) * itemsize


def _reorder_kernel(x_ref, li_ref, pos_ref,
                    w1_ref, w2_ref, v_ref, b12_ref, bv_ref,
                    out_ref):
    """One row tile: two fused linears + tanh, a third linear + sigmoid, gating.

    MXU operands keep the prepared matmul dtype (bf16 fast path on v6e/v7x);
    accumulation and the tanh/sigmoid epilogue are f32.
    """
    # Stage 1: accumulate the two matmuls into one f32 value (MRB in-place acc on v7x).
    h = jnp.dot(li_ref[...], w1_ref[...], preferred_element_type=jnp.float32)
    h = h + jnp.dot(x_ref[...], w2_ref[...], preferred_element_type=jnp.float32)
    h = jnp.tanh(h + b12_ref[...])                       # b12 = b1 + b2 (folded at prep time)
    # Stage 2: third linear + sigmoid.
    p = jnp.dot(h.astype(v_ref.dtype), v_ref[...], preferred_element_type=jnp.float32)
    p = jax.nn.sigmoid(p + bv_ref[...])
    # Gating epilogue in the output dtype (halves VPU + vld/vst traffic on bf16 chips).
    out_ref[...] = p.astype(out_ref.dtype) * pos_ref[...]


def prepare_reordering_params(params, compute_dtype=None):
    """One-time weight preparation (hoisted out of the per-call forward).

    Transposes the PyTorch (out, in) weights to (in, out), casts them to the matmul
    dtype (pass compute_dtype=jnp.bfloat16 on v5e/v6e to use the fast MXU path with
    f32 activations), and folds the two stage-1 biases into a single f32 row vector.
    """
    w_dtype = jnp.dtype(compute_dtype) if compute_dtype is not None \
        else jnp.asarray(params["W1_w"]).dtype

    def wt(w):
        return jnp.asarray(w).T.astype(w_dtype)

    def bias(b):
        return jnp.asarray(b).astype(jnp.float32).reshape(1, -1)

    return {
        "w1t": wt(params["W1_w"]),
        "w2t": wt(params["W2_w"]),
        "vt":  wt(params["V_w"]),
        "b12": bias(params["W1_b"]) + bias(params["W2_b"]),
        "bv":  bias(params["V_b"]),
    }


@functools.partial(jax.jit, static_argnames=("tm",))
def reordering_layer(x, layer_input, position_embedding, prepared,
                     encoder_mask=None, *, tm=None):
    """x, layer_input, position_embedding: (seq_len, batch, embed_dim).

    `prepared` is the dict from prepare_reordering_params (weights already
    transposed / cast / bias-folded — no per-call weight prep).
    """
    del encoder_mask  # unused by the reference forward
    S, B, D = x.shape
    M = S * B
    out_dtype = position_embedding.dtype
    mm_dtype = prepared["w1t"].dtype
    in_isz = jnp.dtype(mm_dtype).itemsize
    out_isz = jnp.dtype(out_dtype).itemsize
    pos_isz = jnp.dtype(position_embedding.dtype).itemsize

    x2 = x.reshape(M, D).astype(mm_dtype)
    li2 = layer_input.reshape(M, D).astype(mm_dtype)
    pos2 = position_embedding.reshape(M, D)
    w1t, w2t, vt = prepared["w1t"], prepared["w2t"], prepared["vt"]
    b12, bv = prepared["b12"], prepared["bv"]

    # ---- generation-aware VMEM budget ------------------------------------------------
    try:
        vmem_cap = int(pltpu.get_tpu_info().vmem_capacity_bytes)
    except Exception:
        vmem_cap = 64 << 20                      # conservative default (v7x per-TC VMEM)
    headroom = 4 << 20
    avail = vmem_cap - headroom

    weight_bytes = 3 * _phys_bytes(D, D, in_isz)     # W1, W2, V resident, single-buffered
    bias_bytes = 2 * _phys_bytes(1, D, 4)
    row_budget = avail - weight_bytes - bias_bytes

    # Deeper input buffering only pays in the HBM-bound small-D regime.
    row_nbuf = 3 if D <= 512 else 2

    def tile_bytes(t):
        # pipelined row streams (x, li in mm dtype; pos in its own dtype)
        # + double-buffered output + f32 h/p intermediates.
        return (row_nbuf * (2 * _phys_bytes(t, D, in_isz) + _phys_bytes(t, D, pos_isz))
                + 2 * _phys_bytes(t, D, out_isz)
                + 2 * _phys_bytes(t, D, 4))

    row_align = max(8, 32 // in_isz)      # 8 for f32, 16 for bf16, 32 for int8/fp8

    # Resident-weight path does not fit (very large D on 64 MiB-VMEM chips): plain XLA.
    if row_budget < tile_bytes(row_align):
        # TODO(synk): replace with a K-streamed Pallas kernel for this regime.
        h = jnp.tanh(jnp.dot(li2, w1t, preferred_element_type=jnp.float32)
                     + jnp.dot(x2, w2t, preferred_element_type=jnp.float32) + b12)
        p = jax.nn.sigmoid(jnp.dot(h.astype(mm_dtype), vt,
                                   preferred_element_type=jnp.float32) + bv)
        return (p.astype(out_dtype) * pos2).reshape(S, B, D)

    # ---- row-tile selection -----------------------------------------------------------
    if tm is None:
        tm = 512 if avail >= (96 << 20) else 256     # bigger tiles on 128 MiB chips
    if tm >= M:
        tm = M                                       # one full block (any M is legal)
    else:
        tm = _align_down(tm, row_align)
    while tm > row_align and tile_bytes(tm) > row_budget:
        tm = _align_down(tm // 2, row_align)

    grid_m = pl.cdiv(M, tm)
    # Give v7x's two TensorCores at least two parallel steps when M allows it.
    if grid_m == 1 and M >= 2 * row_align:
        tm = _round_up(pl.cdiv(M, 2), row_align)
        grid_m = pl.cdiv(M, tm)
    if grid_m <= 2:
        row_nbuf = 2                                 # 3-deep buffering needs > 2 steps

    vmem_need = weight_bytes + bias_bytes + tile_bytes(tm)
    vmem_limit = min(max(int(vmem_need * 1.25) + (4 << 20), 32 << 20),
                     vmem_cap - (1 << 20))

    row_spec = pl.BlockSpec((tm, D), lambda i: (i, 0),
                            pipeline_mode=pl.Buffered(row_nbuf))
    out_row_spec = pl.BlockSpec((tm, D), lambda i: (i, 0))
    # Grid-invariant operands: single buffer (a second pipeline buffer is pure VMEM waste).
    w_spec = pl.BlockSpec((D, D), lambda i: (0, 0), pipeline_mode=pl.Buffered(1))
    b_spec = pl.BlockSpec((1, D), lambda i: (0, 0), pipeline_mode=pl.Buffered(1))

    out = pl.pallas_call(
        _reorder_kernel,
        out_shape=jax.ShapeDtypeStruct((M, D), out_dtype),
        grid_spec=pltpu.PrefetchScalarGridSpec(
            num_scalar_prefetch=0,
            grid=(grid_m,),
            in_specs=[row_spec, row_spec, row_spec,
                      w_spec, w_spec, w_spec,
                      b_spec, b_spec],
            out_specs=out_row_spec,
        ),
        compiler_params=pltpu.CompilerParams(
            dimension_semantics=("parallel",),   # row axis shards across TCs on v7x
            vmem_limit_bytes=vmem_limit,
        ),
    )(x2, li2, pos2, w1t, w2t, vt, b12, bv)

    return out.reshape(S, B, D)


def _reference(x, layer_input, position_embedding, params):
    """Pure-JAX reference of the PyTorch forward for verification."""
    def lin(inp, w, b):
        return inp @ w.T + b
    h = jnp.tanh(lin(layer_input, params["W1_w"], params["W1_b"])
                 + lin(x, params["W2_w"], params["W2_b"]))
    p = jax.nn.sigmoid(lin(h, params["V_w"], params["V_b"]))
    return p * position_embedding


if __name__ == "__main__":
    seq_len, batch, embed_dim = 8, 2, 32

    key = jax.random.PRNGKey(0)
    ks = jax.random.split(key, 10)

    # Deterministic synthetic parameters (PyTorch nn.Linear shapes: (out, in) weights).
    bound = 1.0 / (embed_dim ** 0.5)
    params = {
        "V_w":  jax.random.uniform(ks[0], (embed_dim, embed_dim), jnp.float32, -bound, bound),
        "V_b":  jax.random.uniform(ks[1], (embed_dim,), jnp.float32, -bound, bound),
        "W1_w": jax.random.uniform(ks[2], (embed_dim, embed_dim), jnp.float32, -bound, bound),
        "W1_b": jax.random.uniform(ks[3], (embed_dim,), jnp.float32, -bound, bound),
        "W2_w": jax.random.uniform(ks[4], (embed_dim, embed_dim), jnp.float32, -bound, bound),
        "W2_b": jax.random.uniform(ks[5], (embed_dim,), jnp.float32, -bound, bound),
    }

    x = jax.random.normal(ks[6], (seq_len, batch, embed_dim), jnp.float32)
    layer_input = jax.random.normal(ks[7], (seq_len, batch, embed_dim), jnp.float32)
    position_embedding = jax.random.normal(ks[8], (seq_len, batch, embed_dim), jnp.float32)
    encoder_mask = None  # no padding

    # One-time weight prep (hoisted out of the forward path).
    prepared = prepare_reordering_params(params)

    # f32 path (exact vs. reference).
    out = reordering_layer(x, layer_input, position_embedding, prepared, encoder_mask)
    out = jax.block_until_ready(out)
    ref = _reference(x, layer_input, position_embedding, params)
    assert out.shape == (seq_len, batch, embed_dim)
    assert jnp.allclose(out, ref, atol=1e-5, rtol=1e-5), "f32 mismatch vs reference"

    # bf16 fast path (bf16 MXU operands, f32 accumulation) at a lane-dense size.
    S2, B2, D2 = 16, 8, 256
    xb = jax.random.normal(ks[9], (S2, B2, D2), jnp.float32)
    lib = jnp.roll(xb, 1, axis=0)
    posb = jnp.flip(xb, axis=0)
    b2bound = 1.0 / (D2 ** 0.5)
    kb = jax.random.split(jax.random.PRNGKey(1), 6)
    params_bf = {
        "V_w":  jax.random.uniform(kb[0], (D2, D2), jnp.float32, -b2bound, b2bound),
        "V_b":  jax.random.uniform(kb[1], (D2,), jnp.float32, -b2bound, b2bound),
        "W1_w": jax.random.uniform(kb[2], (D2, D2), jnp.float32, -b2bound, b2bound),
        "W1_b": jax.random.uniform(kb[3], (D2,), jnp.float32, -b2bound, b2bound),
        "W2_w": jax.random.uniform(kb[4], (D2, D2), jnp.float32, -b2bound, b2bound),
        "W2_b": jax.random.uniform(kb[5], (D2,), jnp.float32, -b2bound, b2bound),
    }
    params_bf = {k: v.astype(jnp.bfloat16) for k, v in params_bf.items()}
    prepared_bf = prepare_reordering_params(params_bf)
    out_bf = reordering_layer(xb.astype(jnp.bfloat16), lib.astype(jnp.bfloat16),
                              posb.astype(jnp.bfloat16), prepared_bf, None)
    out_bf = jax.block_until_ready(out_bf)
    ref_bf = _reference(xb.astype(jnp.bfloat16).astype(jnp.float32),
                        lib.astype(jnp.bfloat16).astype(jnp.float32),
                        posb.astype(jnp.bfloat16).astype(jnp.float32),
                        {k: v.astype(jnp.float32) for k, v in params_bf.items()})
    assert jnp.allclose(out_bf.astype(jnp.float32), ref_bf, atol=1e-1, rtol=1e-1), \
        "bf16 mismatch vs reference"

    print("KERNEL_OK")
</pallas_src>

<mosaic_0001>
module attributes {stable_mosaic.version = 11 : i64} {
  func.func @_reorder_kernel(%arg0: i32, %arg1: memref<8x32xf32, #tpu.memory_space<vmem>>, %arg2: memref<8x32xf32, #tpu.memory_space<vmem>>, %arg3: memref<8x32xf32, #tpu.memory_space<vmem>>, %arg4: memref<32x32xf32, #tpu.memory_space<vmem>>, %arg5: memref<32x32xf32, #tpu.memory_space<vmem>>, %arg6: memref<32x32xf32, #tpu.memory_space<vmem>>, %arg7: memref<1x32xf32, #tpu.memory_space<vmem>>, %arg8: memref<1x32xf32, #tpu.memory_space<vmem>>, %arg9: memref<8x32xf32, #tpu.memory_space<vmem>>) attributes {dimension_semantics = [#tpu.dimension_semantics<parallel>], iteration_bounds = array<i64: 2>, scalar_prefetch = 0 : i64, scratch_operands = 0 : i64, tpu.core_type = #tpu.core_type<tc>, window_params = [{pipeline_mode = #tpu.pipeline_mode<double_buffered>, transform_indices = @transform_0, window_bounds = array<i64: 8, 32>}, {pipeline_mode = #tpu.pipeline_mode<double_buffered>, transform_indices = @transform_1, window_bounds = array<i64: 8, 32>}, {pipeline_mode = #tpu.pipeline_mode<double_buffered>, transform_indices = @transform_2, window_bounds = array<i64: 8, 32>}, {pipeline_mode = #tpu.pipeline_mode<synchronous>, transform_indices = @transform_3, window_bounds = array<i64: 32, 32>}, {pipeline_mode = #tpu.pipeline_mode<synchronous>, transform_indices = @transform_4, window_bounds = array<i64: 32, 32>}, {pipeline_mode = #tpu.pipeline_mode<synchronous>, transform_indices = @transform_5, window_bounds = array<i64: 32, 32>}, {pipeline_mode = #tpu.pipeline_mode<synchronous>, transform_indices = @transform_6, window_bounds = array<i64: 1, 32>}, {pipeline_mode = #tpu.pipeline_mode<synchronous>, transform_indices = @transform_7, window_bounds = array<i64: 1, 32>}, {transform_indices = @transform_8, window_bounds = array<i64: 8, 32>}]} {
    %c0 = arith.constant 0 : index
    %c0_0 = arith.constant 0 : index
    %0 = vector.load %arg2[%c0, %c0_0] : memref<8x32xf32, #tpu.memory_space<vmem>>, vector<8x32xf32>
    %c0_1 = arith.constant 0 : index
    %c0_2 = arith.constant 0 : index
    %1 = vector.load %arg4[%c0_1, %c0_2] : memref<32x32xf32, #tpu.memory_space<vmem>>, vector<32x32xf32>
    %cst = arith.constant dense<0.000000e+00> : vector<8x32xf32>
    %2 = tpu.matmul %0, %1, %cst {dimension_numbers = #tpu.dot_dimension_numbers<[1], [0], [0], [1], [0, 0, 1, 1], [], []>} : vector<8x32xf32>, vector<32x32xf32>, vector<8x32xf32> -> vector<8x32xf32>
    %c0_3 = arith.constant 0 : index
    %c0_4 = arith.constant 0 : index
    %3 = vector.load %arg1[%c0_3, %c0_4] : memref<8x32xf32, #tpu.memory_space<vmem>>, vector<8x32xf32>
    %c0_5 = arith.constant 0 : index
    %c0_6 = arith.constant 0 : index
    %4 = vector.load %arg5[%c0_5, %c0_6] : memref<32x32xf32, #tpu.memory_space<vmem>>, vector<32x32xf32>
    %cst_7 = arith.constant dense<0.000000e+00> : vector<8x32xf32>
    %5 = tpu.matmul %3, %4, %cst_7 {dimension_numbers = #tpu.dot_dimension_numbers<[1], [0], [0], [1], [0, 0, 1, 1], [], []>} : vector<8x32xf32>, vector<32x32xf32>, vector<8x32xf32> -> vector<8x32xf32>
    %6 = arith.addf %2, %5 : vector<8x32xf32>
    %c0_8 = arith.constant 0 : index
    %c0_9 = arith.constant 0 : index
    %7 = vector.load %arg7[%c0_8, %c0_9] : memref<1x32xf32, #tpu.memory_space<vmem>>, vector<1x32xf32>
    %8 = vector.broadcast %7 : vector<1x32xf32> to vector<8x32xf32>
    %9 = arith.addf %6, %8 : vector<8x32xf32>
    %10 = math.tanh %9 : vector<8x32xf32>
    %c0_10 = arith.constant 0 : index
    %c0_11 = arith.constant 0 : index
    %11 = vector.load %arg6[%c0_10, %c0_11] : memref<32x32xf32, #tpu.memory_space<vmem>>, vector<32x32xf32>
    %cst_12 = arith.constant dense<0.000000e+00> : vector<8x32xf32>
    %12 = tpu.matmul %10, %11, %cst_12 {dimension_numbers = #tpu.dot_dimension_numbers<[1], [0], [0], [1], [0, 0, 1, 1], [], []>} : vector<8x32xf32>, vector<32x32xf32>, vector<8x32xf32> -> vector<8x32xf32>
    %c0_13 = arith.constant 0 : index
    %c0_14 = arith.constant 0 : index
    %13 = vector.load %arg8[%c0_13, %c0_14] : memref<1x32xf32, #tpu.memory_space<vmem>>, vector<1x32xf32>
    %14 = vector.broadcast %13 : vector<1x32xf32> to vector<8x32xf32>
    %15 = arith.addf %12, %14 : vector<8x32xf32>
    %16 = arith.negf %15 : vector<8x32xf32>
    %17 = math.exp %16 : vector<8x32xf32>
    %cst_15 = arith.constant 1.000000e+00 : f32
    %18 = vector.broadcast %cst_15 : f32 to vector<8x32xf32>
    %19 = arith.addf %18, %17 : vector<8x32xf32>
    %20 = arith.divf %18, %19 : vector<8x32xf32>
    %c0_16 = arith.constant 0 : index
    %c0_17 = arith.constant 0 : index
    %21 = vector.load %arg3[%c0_16, %c0_17] : memref<8x32xf32, #tpu.memory_space<vmem>>, vector<8x32xf32>
    %22 = arith.mulf %20, %21 : vector<8x32xf32>
    %c0_18 = arith.constant 0 : index
    %c0_19 = arith.constant 0 : index
    %23 = vector.load %arg9[%c0_18, %c0_19] : memref<8x32xf32, #tpu.memory_space<vmem>>, vector<8x32xf32>
    tpu.vector_store %arg9[%c0_18, %c0_19], %22 {strides = array<i32>} : memref<8x32xf32, #tpu.memory_space<vmem>>, vector<8x32xf32>,
    return
  }
  func.func @transform_0(%arg0: i32) -> (i32, i32) {
    %c0_i32 = arith.constant 0 : i32
    %c0_i32_0 = arith.constant 0 : i32
    return %arg0, %c0_i32 : i32, i32
  }
  func.func @transform_1(%arg0: i32) -> (i32, i32) {
    %c0_i32 = arith.constant 0 : i32
    %c0_i32_0 = arith.constant 0 : i32
    return %arg0, %c0_i32 : i32, i32
  }
  func.func @transform_2(%arg0: i32) -> (i32, i32) {
    %c0_i32 = arith.constant 0 : i32
    %c0_i32_0 = arith.constant 0 : i32
    return %arg0, %c0_i32 : i32, i32
  }
  func.func @transform_3(%arg0: i32) -> (i32, i32) {
    %c0_i32 = arith.constant 0 : i32
    %c0_i32_0 = arith.constant 0 : i32
    %c0_i32_1 = arith.constant 0 : i32
    return %c0_i32, %c0_i32_0 : i32, i32
  }
  func.func @transform_4(%arg0: i32) -> (i32, i32) {
    %c0_i32 = arith.constant 0 : i32
    %c0_i32_0 = arith.constant 0 : i32
    %c0_i32_1 = arith.constant 0 : i32
    return %c0_i32, %c0_i32_0 : i32, i32
  }
  func.func @transform_5(%arg0: i32) -> (i32, i32) {
    %c0_i32 = arith.constant 0 : i32
    %c0_i32_0 = arith.constant 0 : i32
    %c0_i32_1 = arith.constant 0 : i32
    return %c0_i32, %c0_i32_0 : i32, i32
  }
  func.func @transform_6(%arg0: i32) -> (i32, i32) {
    %c0_i32 = arith.constant 0 : i32
    %c0_i32_0 = arith.constant 0 : i32
    %c0_i32_1 = arith.constant 0 : i32
    return %c0_i32, %c0_i32_0 : i32, i32
  }
  func.func @transform_7(%arg0: i32) -> (i32, i32) {
    %c0_i32 = arith.constant 0 : i32
    %c0_i32_0 = arith.constant 0 : i32
    %c0_i32_1 = arith.constant 0 : i32
    return %c0_i32, %c0_i32_0 : i32, i32
  }
  func.func @transform_8(%arg0: i32) -> (i32, i32) {
    %c0_i32 = arith.constant 0 : i32
    %c0_i32_0 = arith.constant 0 : i32
    return %arg0, %c0_i32 : i32, i32
  }
}

</mosaic_0001>

<bundles_post_ra>
// kernel: reordering_layer.1
= control target key start
LH: loop header
LB: loop body
LE: loop exit
PB: predicated region body
PF: predicated region fallthrough
CT: control target
= control target key end

     0   :  { %s1395_s0 = inlined_call_operand.hbm [shape: f32[16,32], index: 0, kind: input, shape index: {}]   ;;  %s1396_s1 = inlined_call_operand.hbm [shape: f32[16,32], index: 1, kind: input, shape index: {}]   ;;  %s1397_s2 = inlined_call_operand.hbm [shape: f32[16,32], index: 2, kind: input, shape index: {}]   ;;  %s1398_s3 = inlined_call_operand.hbm [shape: f32[32,32], index: 3, kind: input, shape index: {}]   ;;  %s1399_s4 = inlined_call_operand.hbm [shape: f32[32,32], index: 4, kind: input, shape index: {}]   ;;  %s1400_s5 = inlined_call_operand.hbm [shape: f32[32,32], index: 5, kind: input, shape index: {}]   ;;  %s1401_s6 = inlined_call_operand.vmem [shape: f32[1,32], index: 6, kind: input, shape index: {}]   ;;  %s1402_s7 = inlined_call_operand.vmem [shape: f32[1,32], index: 7, kind: input, shape index: {}]   ;;  %s1403_s8 = inlined_call_operand.hbm [shape: f32[16,32], index: 8, kind: output, shape index: {}]  }
   0x1   :  { %1417 = sst [smem:[#allocation25_spill]] %s1396_s1 }
   0x2   :  { %1418 = sst [smem:[#allocation26_spill]] %s1398_s3 }
   0x3   :  { %13 = vsyncpa [#allocation3], 0 }
   0x4   :  { %15 = vsyncpa [#allocation3 + $0x1], 0 }
   0x5   :  { %16 = vsyncpa [#allocation6], 0 }
   0x6   :  { %18 = vsyncpa [#allocation6 + $0x1], 0 }
   0x7   :  { %19 = vsyncpa [#allocation9], 0 }
   0x8   :  { %20 = vsyncpa [#allocation12], 0 }
   0x9   :  { %21 = vsyncpa [#allocation4], 0 }
   0xa   :  { %23 = vsyncpa [#allocation4 + $0x1], 0  ;;  %s1157_s27 = smov 0   ;;  %s1159_s28 = smov 0  }
   0xb   :  { %s1161_s29 = smov 0   ;;  %s1163_s30 = smov 0  }
   0xc LB: > { %1419 = sst [smem:[#allocation19_spill]] %s1093_s27  ;;  %s1181_s12 = sadd.s32 4294967295, %s1105_s30   ;;  %s1105_s30 = sphi %s1163_s30, %s1445_s30   ;;  %s1101_s29 = sphi %s1161_s29, %s1449_s29   ;;  %s1097_s28 = sphi %s1159_s28, %s1448_s28   ;;  %s1093_s27 = sphi %s1157_s27, %s1447_s27  }
   0xd   : > { %1420 = sst [smem:[#allocation20_spill]] %s1105_s30  ;;  %p723_p0 = scmp.ge.s32.totalorder %s1105_s30, 1 }
   0xe   : > { %s1421_s3 = sld [smem:[#allocation26_spill]]  ;;  %p1416_p1 = scmp.eq.s32.totalorder %s1181_s12, 0 }
   0xf   : > { %p243_p2 = scmp.lt.s32.totalorder %s1105_s30, 3  ;;  %s1107_s14 = smov [#allocation8]  }
  0x10   : > { %s256_s15 = sshll.u32 %s1107_s14, 4  ;;  %s1404_s17 = smov 128   ;;  %s257_s15 = int_to_ptr.vmem [resolvable:$true] %s256_s15 }
  0x11   : > { %p1186_p3 = pnand %p723_p0, %p243_p2  ;;  %s1406_s18 = smov 8  }
  0x12   : > { %s722_s19 = sadd.s32 4294967294, %s1105_s30   ;;  %s1206_s20 = sadd.s32 1, %s1105_s30  }
  0x13   : > { %p770_p4 = pneg %p1186_p3  ;;  %1424 = sst [smem:[#allocation21_spill]] %s1206_s20 }
  0x14   : > { %s254_s11 = sshll.u32 %s1421_s3, 4  ;;  %s36_s21 = sadd.s32 1, %s1101_s29  ;;  %s255_s11 = int_to_ptr.hbm [resolvable:$true] %s254_s11 }
  0x15   : > { %p1195_p6 = pnand %p770_p4, %p1416_p1  ;;  %s33_s22 = ssub.s32 %s1105_s30, %s1206_s20 }
  0x16   : > { %p43_p7 = scmp.ne.s32.totalorder %s1101_s29, %s1097_s28  ;;  %p34_p8 = scmp.eq.s32.totalorder %s33_s22, 0 }
  0x17   : > { %773 = dma.hbm_to_vmem [thread:$0]  (!%p1195_p6), %s255_s11, 512, %s257_s15, [#allocation9], %s1404_s17, %s1404_s17, %s1406_s18  }
  0x18   : > { %p44_p9 = scmp.eq.s32.totalorder %s1105_s30, 0  ;;  %p49_p10 = scmp.ne.s32.totalorder %s1097_s28, %s1093_s27 }
  0x19   : > { %p230_p11 = scmp.eq.s32.totalorder %s1181_s12, 1  ;;  %p236_p2 = scmp.eq.s32.totalorder %s722_s19, 1 }
  0x1a   : > { %s1218_s23 = scalar_select %p34_p8, %s1101_s29, %s36_s21  }
  0x1b   : > { %p45_p12 = por %p44_p9, %p43_p7  ;;  %p1222_p13 = por %p1416_p1, %p49_p10 }
  0x1c   : > { %1425 = sst [smem:[#allocation22_spill]] %s1218_s23  ;;  %p1226_p0 = por %p230_p11, %p43_p7 }
  0x1d   : > { %p797_p4 = scmp.lt.s32.totalorder %s1105_s30, 2  ;;  %s1408_s26 = sand.u32 1, %s1101_s29  }
  0x1e   : > { %s1427_s25 = scalar_select %p1226_p0, 1, 0 }
  0x1f   : > { %p1232_p5 = por %p236_p2, %p49_p10  ;;  %s1238_s10 = sshll.u32 %s1408_s26, 3 }
  0x20   : > { %1428 = sst [smem:[#allocation23_spill]] %s1427_s25  ;;  %s1241_s11 = sshll.u32 %s1105_s30, 3 }
  0x21   : > { %s1429_s9 = scalar_select %p1232_p5, 1, 0 }
  0x22   : > { %p1243_p8 = pnand %p797_p4, %p45_p12  ;;  %s323_s15 = sand.u32 1, %s1105_s30  }
  0x23   : > { %1430 = sst [smem:[#allocation24_spill]] %s1429_s9  ;;  %s327_s17 = scalar_lea.vmem [#allocation5], %s1238_s10 }
  0x24   : > { %s1432_s1 = sld [smem:[#allocation25_spill]]  ;;  %s335_s18 = sshll.u32 %s327_s17, 4  ;;  %s336_s18 = int_to_ptr.vmem [resolvable:$true] %s335_s18 }
  0x25   : > { %s268_s20 = sshll.u32 %s1399_s4, 4  ;;  %s1256_s9 = scalar_lea.sflag [#allocation6], %s323_s15  ;;  %s269_s20 = int_to_ptr.hbm [resolvable:$true] %s268_s20 }
  0x26   : > { %p881_p9 = pneg %p1243_p8 }
  0x2a   : > { %s331_s22 = scalar_lea.hbm %s1432_s1, %s1241_s11  ;;  %s884_s21 = scalar_lea.hbm %s1432_s1, 16 }
  0x2b   : > { %s333_s3 = sshll.u32 %s331_s22, 4  ;;  %s334_s3 = int_to_ptr.hbm [resolvable:$true] %s333_s3 }
  0x2c   : > { %s877_s27 = sshra.s32 %s334_s3, 4  ;;  %s878_s27 = int_to_ptr.hbm [resolvable:$true] %s877_s27 }
  0x2d   : > { %s879_s25 = scalar_lea.hbm %s878_s27, 8  ;;  %p885_p12 = scmp.lt.s32.totalorder %s878_s27, %s1432_s1 }
  0x2e   : > { %p880_p7 = scmp.ne.s32.totalorder %s878_s27, %s879_s25  ;;  %p886_p2 = scmp.lt.s32.totalorder %s884_s21, %s879_s25 }
  0x30   : > { %p882_p10 = pnand %p881_p9, %p880_p7  ;;  %p887_p4 = por %p886_p2, %p885_p12 }
  0x32   : > { %p883_p11 = pneg %p882_p10 }
  0x34   : > { %p888_p1 = pnand %p887_p4, %p883_p11 }
  0x36   : > { %891 = shalt.err (!%p888_p1)
}
  0x37   : > { %786 = dma.hbm_to_vmem [thread:$0]  (!%p1243_p8), %s334_s3, 128, %s336_s18, %s1256_s9  }
  0x38   : > { %s1110_s23 = smov [#allocation10]   ;;  %s282_s27 = sshll.u32 %s1400_s5, 4  ;;  %s283_s27 = int_to_ptr.hbm [resolvable:$true] %s282_s27 }
  0x39   : > { %s270_s26 = sshll.u32 %s1110_s23, 4  ;;  %s1433_s30 = smov 8   ;;  %s271_s26 = int_to_ptr.vmem [resolvable:$true] %s270_s26 }
  0x3a   : > { %s1434_s25 = smov 128   ;;  %s1111_s19 = smov [#allocation11]  }
  0x3b   : > { %776 = dma.hbm_to_vmem [thread:$0]  (!%p1195_p6), %s269_s20, 512, %s271_s26, [#allocation9], %s1434_s25, %s1434_s25, %s1433_s30  }
  0x3c   : > { %s284_s21 = sshll.u32 %s1111_s19, 4  ;;  %s312_s22 = scalar_lea.hbm %s1395_s0, %s1241_s11  ;;  %s285_s21 = int_to_ptr.vmem [resolvable:$true] %s284_s21 }
  0x3d   : > { %779 = dma.hbm_to_vmem [thread:$0]  (!%p1195_p6), %s283_s27, 512, %s285_s21, [#allocation12], %s1434_s25, %s1434_s25, %s1433_s30  }
  0x3e   : > { %s314_s23 = sshll.u32 %s312_s22, 4  ;;  %s308_s15 = scalar_lea.vmem [#allocation2], %s1238_s10  ;;  %s315_s23 = int_to_ptr.hbm [resolvable:$true] %s314_s23 }
  0x3f   : > { %s316_s17 = sshll.u32 %s308_s15, 4  ;;  %s1435_s1 = sand.u32 1, %s1101_s29   ;;  %s317_s17 = int_to_ptr.vmem [resolvable:$true] %s316_s17 }
  0x40   : > { %s305_s20 = scalar_lea.sflag [#allocation3], %s1435_s1  ;;  %s967_s26 = sshra.s32 %s315_s23, 4  ;;  %s968_s26 = int_to_ptr.hbm [resolvable:$true] %s967_s26 }
  0x41   : > { %s969_s19 = scalar_lea.hbm %s968_s26, 8  ;;  %s974_s18 = scalar_lea.hbm %s1395_s0, 16 }
  0x42   : > { %p970_p1 = scmp.ne.s32.totalorder %s968_s26, %s969_s19  ;;  %p975_p6 = scmp.lt.s32.totalorder %s968_s26, %s1395_s0 }
  0x43   : > { %p976_p11 = scmp.lt.s32.totalorder %s974_s18, %s969_s19 }
  0x44   : > { %p972_p7 = pnand %p970_p1, %p881_p9 }
  0x45   : > { %p977_p12 = por %p976_p11, %p975_p6 }
  0x46   : > { %p973_p10 = pneg %p972_p7 }
  0x48   : > { %p978_p2 = pnand %p977_p12, %p973_p10 }
  0x4a   : > { %981 = shalt.err (!%p978_p2)
}
  0x4b   : > { %783 = dma.hbm_to_vmem [thread:$0]  (!%p1243_p8), %s315_s23, 128, %s317_s17, %s305_s20  }
  0x4c   : > { %s350_s21 = scalar_lea.hbm %s1397_s2, %s1241_s11  ;;  %s346_s15 = scalar_lea.vmem [#allocation7], %s1238_s10 }
  0x4d   : > { %s352_s22 = sshll.u32 %s350_s21, 4  ;;  %s354_s16 = sshll.u32 %s346_s15, 4  ;;  %s353_s22 = int_to_ptr.hbm [resolvable:$true] %s352_s22  ;;  %s355_s16 = int_to_ptr.vmem [resolvable:$true] %s354_s16 }
  0x4e   : > { %s997_s26 = sshra.s32 %s353_s22, 4  ;;  %s1004_s23 = scalar_lea.hbm %s1397_s2, 16  ;;  %s998_s26 = int_to_ptr.hbm [resolvable:$true] %s997_s26 }
  0x4f   : > { %s999_s19 = scalar_lea.hbm %s998_s26, 8  ;;  %p1005_p10 = scmp.lt.s32.totalorder %s998_s26, %s1397_s2 }
  0x50   : > { %p1000_p4 = scmp.ne.s32.totalorder %s998_s26, %s999_s19  ;;  %p1006_p6 = scmp.lt.s32.totalorder %s1004_s23, %s999_s19 }
  0x52   : > { %p1002_p1 = pnand %p1000_p4, %p881_p9  ;;  %p1007_p11 = por %p1006_p6, %p1005_p10 }
  0x54   : > { %p1003_p7 = pneg %p1002_p1 }
  0x56   : > { %p1008_p12 = pnand %p1007_p11, %p1003_p7 }
  0x58   : > { %1011 = shalt.err (!%p1008_p12)
}
  0x59   : > { %789 = dma.hbm_to_vmem [thread:$0]  (!%p1243_p8), %s353_s22, 128, %s355_s16, %s1256_s9  }
  0x5a   : > { %363 = sbr.rel (%p1186_p3) target bundleno = 418 (0x1a2), region = 52  ;;  %s1323_s10 = sand.u32 (!%p1186_p3), 1, %s1097_s28  }
  0x5b   : > { %s1326_s11 = sshll.u32 (!%p1186_p3), %s1323_s10, 3  ;;  %s366_s27 = scalar_lea.sflag (!%p1186_p3), [#allocation3], %s1323_s10 }
  0x5c   : > { %s369_s30 = scalar_lea.vmem (!%p1186_p3), [#allocation2], %s1326_s11 }
  0x5f   : > { %1072 = dma.done.wait (%p1222_p13), %s366_s27, 128  }
  0x60   : > { %1074 = vsyncadd (%p1222_p13), %s366_s27, 4294967168  ;;  %s375_s13 = sand.u32 1, %s1181_s12   ;;  %s379_s14 = scalar_lea.vmem [#allocation5], %s1326_s11 }
  0x61   : > { %s376_s9 = scalar_lea.sflag [#allocation6], %s375_s13 }
  0x62   : > { %1076 = dma.done.wait (%p1222_p13), %s376_s9, 256  }
  0x63   : > { %1078 = vsyncadd (%p1222_p13), %s376_s9, 4294967040  ;;  %s389_s1 = scalar_lea.vmem [#allocation7], %s1326_s11  ;;  %p1436_p3 = scmp.eq.s32.totalorder %s1181_s12, 0 }
  0x65   : > { %1080 = dma.done.wait (%p1436_p3), [#allocation9], 1024   ;;  %p1437_p8 = pmov %p1436_p3 }
  0x66   : > { %p1438_p9 = pmov %p1436_p3 }
  0x67   : > { %1082 = vsyncadd (%p1437_p8), [#allocation9], 4294966272 }
  0x68   : > { %1084 = dma.done.wait (%p1438_p9), [#allocation12], 512   ;;  %p1439_p2 = pmov %p1436_p3 }
  0x69   : > { %v457_v0 = vld [vmem:[#allocation10 + $0x18] sm:$0xff]  ;;  %v456_v2 = vld [vmem:[#allocation10 + $0x10] sm:$0xff]  ;;  %v455_v4 = vld [vmem:[#allocation10 + $0x8] sm:$0xff]  ;;  %vm458_vm0 = vcmask 261120   ;;  %s747_s15 = sshll.u32 %s1181_s12, 3  ;;  %s447_s18 = scalar_lea.vmem [#allocation13], %s1326_s11 }
  0x6a   : > { %1086 = vsyncadd (%p1439_p2), [#allocation12], 4294966784  ;;  %v452_v1 = vld [vmem:[#allocation8 + $0x18] sm:$0xff]  ;;  %474 = vmatpush.msra.mxu0 %v457_v0  ;;  %v451_v3 = vld [vmem:[#allocation8 + $0x10] sm:$0xff]  ;;  %s575_s19 = scalar_lea.hbm %s1403_s8, %s747_s15  ;;  %s577_s23 = sshll.u32 %s447_s18, 4  ;;  %s578_s23 = int_to_ptr.vmem [resolvable:$true] %s577_s23 }
  0x6b   : > { %497 = vmatpush.msra.mxu1 %v452_v1  ;;  %v450_v5 = vld [vmem:[#allocation8 + $0x8] sm:$0xff]  ;;  %v454_v6 = vld [vmem:[#allocation10] sm:$0xff]  ;;  %v453_v8 = vld [vmem:[%s369_s30] sm:$0xff]  ;;  %s579_s12 = sshll.u32 %s575_s19, 4  ;;  %s565_s17 = scalar_lea.sflag [#allocation4], %s1323_s10  ;;  %s580_s12 = int_to_ptr.hbm [resolvable:$true] %s579_s12 }
  0x6c   : > { %475 = vmatpush.msra.mxu0 %v456_v2  ;;  %v449_v7 = vld [vmem:[#allocation8] sm:$0xff]  ;;  %v514_v10 = vld [vmem:[#allocation11 + $0x18] sm:$0xff]  ;;  %v513_v11 = vld [vmem:[#allocation11 + $0x10] sm:$0xff]  ;;  %s1041_s20 = sshra.s32 %s580_s12, 4  ;;  %s1047_s13 = scalar_lea.hbm %s1403_s8, 16  ;;  %s1042_s20 = int_to_ptr.hbm [resolvable:$true] %s1041_s20 }
  0x6d   : > { %498 = vmatpush.msra.mxu1 %v451_v3  ;;  %v448_v9 = vld [vmem:[%s379_s14] sm:$0xff]  ;;  %534 = vmatpush.msra.mxu2 %v514_v10  ;;  %v839_v14 = vld [vmem:[%s1401_s6] ss:$0 sm:$0xff]  ;;  %s1043_s27 = scalar_lea.hbm %s1042_s20, 8  ;;  %p1048_p7 = scmp.lt.s32.totalorder %s1042_s20, %s1403_s8 }
  0x6e   : > { %476 = vmatpush.msra.mxu0 %v455_v4  ;;  %v512_v12 = vld [vmem:[#allocation11 + $0x8] sm:$0xff]  ;;  %v511_v13 = vld [vmem:[#allocation11] sm:$0xff]  ;;  %v840_v20 = vld [vmem:[%s1402_s7] ss:$0 sm:$0xff]  ;;  %p1044_p13 = scmp.ne.s32.totalorder %s1042_s20, %s1043_s27  ;;  %p1049_p10 = scmp.lt.s32.totalorder %s1047_s13, %s1043_s27 }
  0x6f   : > { %499 = vmatpush.msra.mxu1 %v450_v5  ;;  %535 = vmatpush.msra.mxu2 %v513_v11  ;;  %v561_v34 = vld [vmem:[%s389_s1] sm:$0xff] }
  0x70   : > { %477 = vmatpush.msra.mxu0 %v454_v6  ;;  %p1045_p4 = pnand %p1044_p13, %p1226_p0  ;;  %p1050_p6 = por %p1049_p10, %p1048_p7 }
  0x71   : > { %500 = vmatpush.msra.mxu1 %v449_v7  ;;  %742 = vmatmul.msk.f32.vlgmr.msra.gmra.mxu0 %vm458_vm0, %v453_v8 }
  0x72   : > { %743 = vmatmul.msk.f32.vlgmr.msra.gmra.mxu1 %vm458_vm0, %v448_v9  ;;  %536 = vmatpush.msra.mxu2 %v512_v12  ;;  %p1046_p1 = pneg %p1045_p4 }
  0x74   : > { %537 = vmatpush.msra.mxu2 %v511_v13  ;;  %p1051_p11 = pnand %p1050_p6, %p1046_p1 }
  0xee   : > { %v479_v15 = vpop.f32.mrf.mxu0 }
  0xef   : > { %v502_v16 = vpop.f32.mrf.mxu1 }
  0xf0   : > { %v503_v17 = vadd.f32 %v502_v16, %v479_v15 }
  0xf2   : > { %v509_v18 = vadd.f32 %v839_v14, %v503_v17 }
  0xf4   : > { %841 = vtanh.f32 %v509_v18 }
  0xfa   : > { %v842_v19 = vpop.eup %841 }
  0xfb   : > { %744 = vmatmul.msk.f32.vlgmr.msra.gmra.mxu2 %vm458_vm0, %v842_v19 }
 0x17e   : > { %v539_v21 = vpop.f32.mrf.mxu2 }
 0x17f   : > { %v540_v22 = vadd.f32 %v840_v20, %v539_v21 }
 0x181   : > { %v745_v23 = vmul.f32 -1.442695, %v540_v22 }
 0x183   : > { %843 = vpow2.f32 %v745_v23 }
 0x189   : > { %v844_v24 = vpop.eup %843 }
 0x18a   : > { %v545_v25 = vadd.f32 1.0, %v844_v24 }
 0x18c   : > { %845 = vrcp.f32 %v545_v25  ;;  %v557_v29 = vand.u32 2147483648, %v545_v25  ;;  %v555_v31 = vand.u32 2147483647, %v545_v25  ;;  %vm551_vm2 = vweird.f32 %v545_v25 }
 0x18e   : > { %v558_v33 = vor.u32 1.1754944e-38, %v557_v29  ;;  %vm556_vm4 = vcmp.eq.f32.partialorder %v555_v31, 8.507059e+37 }
 0x192   : > { %v846_v26 = vpop.eup %845 }
 0x193   : > { %v547_v27 = vmul.f32 %v846_v26, %v545_v25  ;;  %vm552_vm1 = vweird.f32 %v846_v26 }
 0x194   : > { %vm553_vm3 = vmor %vm551_vm2, %vm552_vm1 }
 0x195   : > { %v548_v28 = vsub.f32 1.0, %v547_v27 }
 0x197   : > { %v549_v30 = vmul.f32 %v846_v26, %v548_v28 }
 0x199   : > { %v550_v32 = vadd.f32 %v846_v26, %v549_v30 }
 0x19b   : > { %v554_v35 = vsel %vm553_vm3, %v846_v26, %v550_v32 }
 0x19c   : > { %v559_v36 = vsel %vm556_vm4, %v558_v33, %v554_v35 }
 0x19d   : > { %v562_v37 = vmul.f32 %v561_v34, %v559_v36 }
 0x19f   : > { %563 = vst.msk [vmem:[%s447_s18] sm:$0xff] %vm458_vm0, %v562_v37 }
 0x1a0   : > { %1054 = shalt.err (!%p1051_p11)
}
 0x1a1   : > { %768 = dma.vmem_to_hbm [thread:$0]  (%p1226_p0), %s578_s23, 128, %s580_s12, %s565_s17  }
 0x1a2 PF: > { %s1441_s10 = sld [smem:[#allocation19_spill]] }
 0x1a3   : > { %s1443_s24 = sld [smem:[#allocation20_spill]] }
 0x1a8   : > { %s591_s25 = sand.u32 1, %s1441_s10  }
 0x1a9   : > { %p1444_p12 = scmp.ge.s32.totalorder %s1443_s24, 2  ;;  %s592_s21 = scalar_lea.sflag [#allocation4], %s591_s25 }
 0x1ab   : > { %p791_p3 = pnand %p1444_p12, %p1232_p5 }
 0x1ad   : > { %p792_p8 = pneg %p791_p3 }
 0x1af   : > { %1088 = dma.done.wait (%p792_p8), %s592_s21, 128  }
 0x1b0   : > { %1090 = vsyncadd (%p792_p8), %s592_s21, 4294967168  ;;  %s1445_s30 = sld [smem:[#allocation21_spill]]  ;;  %s1447_s27 = smov %s1097_s28 }
 0x1b1   : > { %s1446_s22 = sld [smem:[#allocation22_spill]]  ;;  %s1448_s28 = smov %s1101_s29 }
 0x1b6   : > { %p26_p9 = scmp.ge.s32.totalorder %s1445_s30, 4  }
 0x1b7   : > { %s1449_s29 = smov %s1446_s22 }
 0x1b8   :  { %28 = sbr.rel (!%p26_p9) target bundleno = 12 (0xc), region = 133 }
 0x1bd   :  { %598 = vsyncpa [#allocation3], 1 }
 0x1be   :  { %600 = vsyncpa [#allocation3 + $0x1], 1 }
 0x1bf   :  { %601 = vsyncpa [#allocation6], 1 }
 0x1c0   :  { %603 = vsyncpa [#allocation6 + $0x1], 1 }
 0x1c1   :  { %604 = vsyncpa [#allocation9], 1 }
 0x1c2   :  { %605 = vsyncpa [#allocation12], 1 }
 0x1c3   :  { %606 = vsyncpa [#allocation4], 1 }
 0x1c4   :  { %608 = vsyncpa [#allocation4 + $0x1], 1 }

</bundles_post_ra>
